<compile_context>
chip_gen: v7x
topology: tpu7x:2x2x1
jax: 0.10.0
libtpu: 0.0.40
codegen_flags: <defaults>
</compile_context>

<pallas_src>
import functools
import math

import numpy as np
import jax
import jax.numpy as jnp
from jax.experimental import pallas as pl
from jax.experimental.pallas import tpu as pltpu


def make_rope_tables(theta: float, d_k: int, max_seq_len: int):
    """(L, d_k) cos table and sign-alternated sin table (sin at even lanes, -sin at odd)."""
    d_half = d_k // 2
    i = jnp.arange(max_seq_len, dtype=jnp.float32)[:, None]            # (L, 1)
    k = jnp.arange(d_half, dtype=jnp.float32)[None, :]                 # (1, d/2)
    angle = i / jnp.power(jnp.float32(theta), 2.0 * k / jnp.float32(d_k))
    cos = jnp.cos(angle)
    sin = jnp.sin(angle)
    cos_full = jnp.stack([cos, cos], axis=-1).reshape(max_seq_len, d_k)
    sin_signed = jnp.stack([sin, -sin], axis=-1).reshape(max_seq_len, d_k)
    return cos_full, sin_signed


@functools.lru_cache(maxsize=None)
def _probe_roll_prev_shift(d_k: int):
    """Shift s such that pltpu.roll(x, s, axis=-1)[..., j] == x[..., j-1], or None.

    A tiny one-time probe pins down the lane-rotate direction convention and whether
    pltpu.roll lowers for this lane width; None -> kernel falls back to jnp.roll.
    """
    if d_k < 4:
        return None
    try:
        def probe(x_ref, o_ref):
            o_ref[...] = pltpu.roll(x_ref[...], 1, 1)

        x = jnp.broadcast_to(jnp.arange(d_k, dtype=jnp.float32), (8, d_k))
        out = np.asarray(
            pl.pallas_call(probe, out_shape=jax.ShapeDtypeStruct((8, d_k), jnp.float32))(x))
        if out[0, 1] == 0.0 and out[0, 2] == 1.0:      # numpy convention: out[j] = x[j-1]
            return 1
        if out[0, 0] == 1.0 and out[0, 1] == 2.0:      # reversed convention
            return d_k - 1
    except Exception:
        pass
    return None


def _rope_kernel(x_ref, cos_ref, sin_ref, par_ref, o_ref, *, prev_shift, d_k):
    x = x_ref[...]                       # (tS, d_k)
    c = cos_ref[...]                     # (tS, d_k)
    s = sin_ref[...]                     # (tS, d_k) sign-alternated sin
    if prev_shift is None:
        x_prev = jnp.roll(x, 1, axis=-1)                        # x_prev[j] = x[j-1]
        x_next = jnp.roll(x, -1, axis=-1)                       # x_next[j] = x[j+1]
    else:
        x_prev = pltpu.roll(x, prev_shift, 1)                   # single XLU vrot
        x_next = pltpu.roll(x, (d_k - prev_shift) % d_k, 1)
    # Pair partner: even lanes take x[j+1], odd lanes take x[j-1]; the sign for the odd
    # lanes is baked into the sin table. Roll wrap lanes land on the opposite-parity
    # branch, so wrapped values are never used.
    rot = jnp.where(par_ref[...] != 0, x_next, x_prev)
    xf = x.astype(c.dtype)
    rf = rot.astype(c.dtype)
    o_ref[...] = (c * xf + s * rf).astype(o_ref.dtype)


def _pick_seq_tile(S: int, d_k: int, itemsize: int) -> int:
    """Largest multiple-of-8 divisor of S such that a (tS, d_k) block is ~<= 1 MiB."""
    bytes_per_row = max(1, d_k * itemsize)
    cap = max(8, (1 << 20) // bytes_per_row)
    cand = [t for t in range(8, min(S, cap) + 1, 8) if S % t == 0]
    return max(cand) if cand else S     # small / odd S: one full-S block (full dim is legal)


def rope_forward(x, token_positions, cos_table, sin_signed, *, donate_x=False):
    """x: (..., S, d_k); token_positions broadcastable to x.shape[:-1]; returns x.shape."""
    x = jnp.asarray(x)
    orig_shape = x.shape
    S, d_k = x.shape[-2], x.shape[-1]
    assert d_k % 2 == 0, "d_k must be even"
    L = cos_table.shape[0]
    lead = x.shape[:-2]
    BH = int(math.prod(lead)) if lead else 1

    tp = jnp.asarray(token_positions)
    pos_full_shape = lead + (S,)
    pshape = (1,) * (len(pos_full_shape) - tp.ndim) + tuple(tp.shape)

    # Trailing leading dims along which positions are constant ("head-like" dims, product h).
    h = 1
    i = len(lead) - 1
    while i >= 0 and pshape[i] == 1:
        h *= int(lead[i])
        i -= 1
    h = max(h, 1)
    Bp = BH // h

    xb = x.reshape(BH, S, d_k)
    pos_bs = jnp.broadcast_to(jnp.reshape(tp, pshape), pos_full_shape)
    pos_bs = pos_bs.reshape(Bp, h, S)[:, 0, :]                 # (Bp, S)

    # Fast path: concrete, contiguous, shared-base positions -> static table slice, no gather.
    base = None
    try:
        pos_host = np.asarray(pos_bs)                          # raises under tracing
        b0 = int(pos_host[0, 0])
        if (pos_host == (b0 + np.arange(S))[None, :]).all() and 0 <= b0 and b0 + S <= L:
            base = b0
    except Exception:
        base = None

    # bf16 inputs keep bf16 tables/compute (v6e/v7x); otherwise f32.
    # (On v5e, which lacks bf16 VALU, forcing f32 here may be preferable.)
    tab_dtype = jnp.bfloat16 if x.dtype == jnp.bfloat16 else jnp.float32

    if base is not None:
        cos_rows = cos_table[base:base + S].astype(tab_dtype).reshape(1, S, d_k)
        sin_rows = sin_signed[base:base + S].astype(tab_dtype).reshape(1, S, d_k)
        cs_index = lambda si, bh: (0, si, 0)
    else:
        # Scattered positions: gather once per batch row in the wrapper (HBM gather by XLA),
        # shared across the h head-like dims; note out-of-range positions are clamped.
        idx = jnp.clip(pos_bs.astype(jnp.int32), 0, L - 1)
        cos_rows = jnp.take(cos_table, idx, axis=0).astype(tab_dtype)   # (Bp, S, d_k)
        sin_rows = jnp.take(sin_signed, idx, axis=0).astype(tab_dtype)
        cs_index = lambda si, bh: (bh // h, si, 0)

    parity = (jnp.arange(d_k, dtype=jnp.int32) % 2 == 0).astype(jnp.int32).reshape(1, d_k)

    x_itemsize = x.dtype.itemsize
    tab_itemsize = np.dtype(tab_dtype).itemsize
    tS = _pick_seq_tile(S, d_k, max(x_itemsize, tab_itemsize))
    # Grid ordered (seq_tiles, batch*heads): while only the head index changes, the cos/sin
    # block index is unchanged and Pallas skips its re-DMA (shared across heads).
    grid = (S // tS, BH)

    prev_shift = _probe_roll_prev_shift(d_k)
    kernel = functools.partial(_rope_kernel, prev_shift=prev_shift, d_k=d_k)

    x_spec = pl.BlockSpec((None, tS, d_k), lambda si, bh: (bh, si, 0))
    cs_spec = pl.BlockSpec((None, tS, d_k), cs_index)
    par_spec = pl.BlockSpec((1, d_k), lambda si, bh: (0, 0))

    # VMEM limit from actual buffer sizes (double-buffered x/out/cos/sin) + headroom.
    blk_x = tS * d_k * x_itemsize
    blk_t = tS * d_k * tab_itemsize
    need = 4 * blk_x + 4 * blk_t + 4 * d_k + (64 << 10)
    vmem_limit = int(min(max(2 * need, 8 << 20), 48 << 20))
    vmem_limit = max(vmem_limit, need + (1 << 20))

    out = pl.pallas_call(
        kernel,
        out_shape=jax.ShapeDtypeStruct((BH, S, d_k), x.dtype),
        grid=grid,
        in_specs=[x_spec, cs_spec, cs_spec, par_spec],
        out_specs=x_spec,
        input_output_aliases={0: 0} if donate_x else {},
        compiler_params=pltpu.CompilerParams(
            dimension_semantics=("parallel", "parallel"),
            vmem_limit_bytes=vmem_limit,
        ),
    )(xb, cos_rows, sin_rows, parity)

    return out.reshape(orig_shape)


def rope_reference(x, token_positions, theta, d_k):
    """Pure-JAX reference mirroring the PyTorch einsum semantics (interleaved pairs)."""
    d_half = d_k // 2
    pos = jnp.broadcast_to(token_positions, x.shape[:-1]).astype(jnp.float32)
    k = jnp.arange(d_half, dtype=jnp.float32)
    ang = pos[..., None] / jnp.power(jnp.float32(theta), 2.0 * k / jnp.float32(d_k))
    c, s = jnp.cos(ang), jnp.sin(ang)
    xp = x.reshape(x.shape[:-1] + (d_half, 2))
    x0, x1 = xp[..., 0], xp[..., 1]
    r0 = c * x0 + s * x1
    r1 = -s * x0 + c * x1
    return jnp.stack([r0, r1], axis=-1).reshape(x.shape)


if __name__ == "__main__":
    theta = 10000.0
    max_seq_len = 32
    key = jax.random.PRNGKey(0)
    k1, k2, k3 = jax.random.split(key, 3)

    # Case 1: prefill-style contiguous positions shared across batch & heads
    # (fast path: static table slice, lane-dense d_k=128, cos/sin shared across heads).
    d_k1, B1, H1, S1 = 128, 2, 2, 16
    x1 = jax.random.normal(k1, (B1, H1, S1, d_k1), dtype=jnp.float32)
    pos1 = jnp.arange(S1, dtype=jnp.int32)
    cos1, sin1 = make_rope_tables(theta, d_k1, max_seq_len)
    ref1 = rope_reference(x1, pos1, theta, d_k1)
    out1 = jax.block_until_ready(rope_forward(x1, pos1, cos1, sin1))
    assert out1.shape == x1.shape
    assert jnp.allclose(out1, ref1, atol=1e-5, rtol=1e-5), "fast-path mismatch vs reference"

    # Case 2: scattered per-(batch, seq) positions (wrapper-gather fallback, d_k=64).
    d_k2, B2, S2 = 64, 2, 8
    x2 = jax.random.normal(k2, (B2, S2, d_k2), dtype=jnp.float32)
    pos2 = jax.random.randint(k3, (B2, S2), 0, max_seq_len, dtype=jnp.int32)
    cos2, sin2 = make_rope_tables(theta, d_k2, max_seq_len)
    ref2 = rope_reference(x2, pos2, theta, d_k2)
    out2 = jax.block_until_ready(rope_forward(x2, pos2, cos2, sin2))
    assert out2.shape == x2.shape
    assert jnp.allclose(out2, ref2, atol=1e-5, rtol=1e-5), "fallback mismatch vs reference"

    print("KERNEL_OK")
</pallas_src>

<mosaic_0001>
module attributes {stable_mosaic.version = 11 : i64} {
  func.func @probe(%arg0: memref<8x128xf32, #tpu.memory_space<vmem>>, %arg1: memref<8x128xf32, #tpu.memory_space<vmem>>) attributes {dimension_semantics = [], scalar_prefetch = 0 : i64, scratch_operands = 0 : i64, tpu.core_type = #tpu.core_type<tc>} {
    %c0 = arith.constant 0 : index
    %c0_0 = arith.constant 0 : index
    %0 = vector.load %arg0[%c0, %c0_0] : memref<8x128xf32, #tpu.memory_space<vmem>>, vector<8x128xf32>
    %c1_i32 = arith.constant 1 : i32
    %1 = tpu.dynamic_rotate %0 by %c1_i32 dim 1 : vector<8x128xf32>, i32 -> vector<8x128xf32>
    %c0_1 = arith.constant 0 : index
    %c0_2 = arith.constant 0 : index
    %2 = vector.load %arg1[%c0_1, %c0_2] : memref<8x128xf32, #tpu.memory_space<vmem>>, vector<8x128xf32>
    tpu.vector_store %arg1[%c0_1, %c0_2], %1 {strides = array<i32>} : memref<8x128xf32, #tpu.memory_space<vmem>>, vector<8x128xf32>,
    return
  }
}

module attributes {stable_mosaic.version = 11 : i64} {
  func.func @_rope_kernel(%arg0: i32, %arg1: i32, %arg2: memref<1x16x128xf32, #tpu.memory_space<vmem>>, %arg3: memref<1x16x128xf32, #tpu.memory_space<vmem>>, %arg4: memref<1x16x128xf32, #tpu.memory_space<vmem>>, %arg5: memref<1x128xi32, #tpu.memory_space<vmem>>, %arg6: memref<1x16x128xf32, #tpu.memory_space<vmem>>) attributes {dimension_semantics = [#tpu.dimension_semantics<parallel>, #tpu.dimension_semantics<parallel>], iteration_bounds = array<i64: 1, 4>, scalar_prefetch = 0 : i64, scratch_operands = 0 : i64, tpu.core_type = #tpu.core_type<tc>, window_params = [{transform_indices = @transform_0, window_bounds = array<i64: 1, 16, 128>}, {transform_indices = @transform_1, window_bounds = array<i64: 1, 16, 128>}, {transform_indices = @transform_2, window_bounds = array<i64: 1, 16, 128>}, {pipeline_mode = #tpu.pipeline_mode<synchronous>, transform_indices = @transform_3, window_bounds = array<i64: 1, 128>}, {transform_indices = @transform_4, window_bounds = array<i64: 1, 16, 128>}]} {
    %c0 = arith.constant 0 : index
    %c0_0 = arith.constant 0 : index
    %c0_1 = arith.constant 0 : index
    %0 = vector.load %arg2[%c0, %c0_0, %c0_1] : memref<1x16x128xf32, #tpu.memory_space<vmem>>, vector<1x16x128xf32>
    %1 = vector.shape_cast %0 : vector<1x16x128xf32> to vector<16x128xf32>
    %c0_2 = arith.constant 0 : index
    %c0_3 = arith.constant 0 : index
    %c0_4 = arith.constant 0 : index
    %2 = vector.load %arg3[%c0_2, %c0_3, %c0_4] : memref<1x16x128xf32, #tpu.memory_space<vmem>>, vector<1x16x128xf32>
    %3 = vector.shape_cast %2 : vector<1x16x128xf32> to vector<16x128xf32>
    %c0_5 = arith.constant 0 : index
    %c0_6 = arith.constant 0 : index
    %c0_7 = arith.constant 0 : index
    %4 = vector.load %arg4[%c0_5, %c0_6, %c0_7] : memref<1x16x128xf32, #tpu.memory_space<vmem>>, vector<1x16x128xf32>
    %5 = vector.shape_cast %4 : vector<1x16x128xf32> to vector<16x128xf32>
    %6 = vector.extract_strided_slice %1 {offsets = [0, 127], sizes = [16, 1], strides = [1, 1]} : vector<16x128xf32> to vector<16x1xf32>
    %7 = vector.extract_strided_slice %1 {offsets = [0, 0], sizes = [16, 127], strides = [1, 1]} : vector<16x128xf32> to vector<16x127xf32>
    %8 = tpu.concatenate %6, %7 in 1 : vector<16x1xf32>, vector<16x127xf32> -> vector<16x128xf32>
    %9 = vector.extract_strided_slice %1 {offsets = [0, 1], sizes = [16, 127], strides = [1, 1]} : vector<16x128xf32> to vector<16x127xf32>
    %10 = vector.extract_strided_slice %1 {offsets = [0, 0], sizes = [16, 1], strides = [1, 1]} : vector<16x128xf32> to vector<16x1xf32>
    %11 = tpu.concatenate %9, %10 in 1 : vector<16x127xf32>, vector<16x1xf32> -> vector<16x128xf32>
    %c0_8 = arith.constant 0 : index
    %c0_9 = arith.constant 0 : index
    %12 = vector.load %arg5[%c0_8, %c0_9] : memref<1x128xi32, #tpu.memory_space<vmem>>, vector<1x128xi32>
    %c0_i32 = arith.constant 0 : i32
    %13 = vector.broadcast %c0_i32 : i32 to vector<1x128xi32>
    %14 = arith.cmpi ne, %12, %13 : vector<1x128xi32>
    %15 = vector.shape_cast %14 : vector<1x128xi1> to vector<1x128xi1>
    %16 = vector.broadcast %15 : vector<1x128xi1> to vector<16x128xi1>
    %17 = arith.select %16, %11, %8 : vector<16x128xi1>, vector<16x128xf32>
    %18 = arith.mulf %3, %1 : vector<16x128xf32>
    %19 = arith.mulf %5, %17 : vector<16x128xf32>
    %20 = arith.addf %18, %19 : vector<16x128xf32>
    %c0_10 = arith.constant 0 : index
    %c0_11 = arith.constant 0 : index
    %c0_12 = arith.constant 0 : index
    %21 = vector.load %arg6[%c0_10, %c0_11, %c0_12] : memref<1x16x128xf32, #tpu.memory_space<vmem>>, vector<1x16x128xf32>
    %22 = vector.shape_cast %21 : vector<1x16x128xf32> to vector<16x128xf32>
    %23 = vector.shape_cast %20 : vector<16x128xf32> to vector<1x16x128xf32>
    tpu.vector_store %arg6[%c0_10, %c0_11, %c0_12], %23 {strides = array<i32>} : memref<1x16x128xf32, #tpu.memory_space<vmem>>, vector<1x16x128xf32>,
    return
  }
  func.func @transform_0(%arg0: i32, %arg1: i32) -> (i32, i32, i32) {
    %c0_i32 = arith.constant 0 : i32
    %c0_i32_0 = arith.constant 0 : i32
    return %arg1, %arg0, %c0_i32 : i32, i32, i32
  }
  func.func @transform_1(%arg0: i32, %arg1: i32) -> (i32, i32, i32) {
    %c0_i32 = arith.constant 0 : i32
    %c0_i32_0 = arith.constant 0 : i32
    %c0_i32_1 = arith.constant 0 : i32
    return %c0_i32, %arg0, %c0_i32_0 : i32, i32, i32
  }
  func.func @transform_2(%arg0: i32, %arg1: i32) -> (i32, i32, i32) {
    %c0_i32 = arith.constant 0 : i32
    %c0_i32_0 = arith.constant 0 : i32
    %c0_i32_1 = arith.constant 0 : i32
    return %c0_i32, %arg0, %c0_i32_0 : i32, i32, i32
  }
  func.func @transform_3(%arg0: i32, %arg1: i32) -> (i32, i32) {
    %c0_i32 = arith.constant 0 : i32
    %c0_i32_0 = arith.constant 0 : i32
    %c0_i32_1 = arith.constant 0 : i32
    return %c0_i32, %c0_i32_0 : i32, i32
  }
  func.func @transform_4(%arg0: i32, %arg1: i32) -> (i32, i32, i32) {
    %c0_i32 = arith.constant 0 : i32
    %c0_i32_0 = arith.constant 0 : i32
    return %arg1, %arg0, %c0_i32 : i32, i32, i32
  }
}

</mosaic_0001>

<bundles_post_ra>
// kernel: tpu_custom_call.1
= control target key start
LH: loop header
LB: loop body
LE: loop exit
PB: predicated region body
PF: predicated region fallthrough
CT: control target
= control target key end

     0   :  { %6 = vsyncpa [#allocation3], 0  ;;  %s128_s0 = inlined_call_operand.hbm [shape: f32[8,128], index: 0, kind: input, shape index: {}]   ;;  %s129_s1 = inlined_call_operand.hbm [shape: f32[8,128], index: 1, kind: output, shape index: {}]  }
   0x1   :  { %7 = vsyncpa [#allocation4], 0  ;;  %s91_s6 = smov [#allocation2]   ;;  %s43_s10 = scalar_lea.hbm %s128_s0, 128 }
   0x2   :  { %s14_s7 = sshll.u32 %s91_s6, 4  ;;  %p44_p0 = scmp.ne.s32.totalorder %s128_s0, %s43_s10  ;;  %s15_s7 = int_to_ptr.vmem [resolvable:$true] %s14_s7 }
   0x3   :  { %p47_p1 = scmp.lt.u32.totalorder %s43_s10, %s128_s0 }
   0x5   :  { %p49_p2 = pnand %p47_p1, %p44_p0 }
   0x7   :  { %52 = shalt.err (!%p49_p2)
}
   0x8   :  { %s53_s15 = scalar_lea.vmem %s15_s7, 128  ;;  %p58_p4 = scmp.lt.s32.totalorder %s15_s7, %s15_s7 }
   0x9   :  { %p54_p3 = scmp.ne.s32.totalorder %s15_s7, %s53_s15  ;;  %p59_p5 = scmp.lt.s32.totalorder %s53_s15, %s53_s15 }
   0xb   :  { %p60_p6 = por %p59_p5, %p58_p4 }
   0xd   :  { %p61_p7 = pnand %p60_p6, %p54_p3 }
   0xf   :  { %64 = shalt.err (!%p61_p7)
}
  0x10   :  { %17 = dma.hbm_to_vmem [thread:$0]  %s128_s0, 128, %s15_s7, [#allocation3]  }
  0x11   :  { %87 = dma.done.wait [#allocation3], 128  }
  0x12   :  { %88 = vsyncadd [#allocation3], 4294967168  ;;  %v21_v0 = vld [vmem:[#allocation2] sm:$0xff]  ;;  %s92_s18 = smov 1   ;;  %s93_s19 = smov [#allocation5]  }
  0x13   :  { %22 = vrot.lane.b32.xlu0 %v21_v0, %s92_s18  ;;  %s31_s20 = sshll.u32 %s93_s19, 4  ;;  %s32_s20 = int_to_ptr.vmem [resolvable:$true] %s31_s20 }
  0x14   :  { %s65_s21 = scalar_lea.vmem %s32_s20, 128  ;;  %p70_p9 = scmp.lt.s32.totalorder %s32_s20, %s32_s20 }
  0x15   :  { %p66_p8 = scmp.ne.s32.totalorder %s32_s20, %s65_s21  ;;  %p71_p10 = scmp.lt.s32.totalorder %s65_s21, %s65_s21 }
  0x17   :  { %p72_p11 = por %p71_p10, %p70_p9 }
  0x19   :  { %p73_p12 = pnand %p72_p11, %p66_p8 }
  0x85   :  { %v23_v1 = vpop.permute.xlu0 %22 }
  0x86   :  { %24 = vst [vmem:[#allocation5] sm:$0xff] %v23_v1 }
  0x87   :  { %76 = shalt.err (!%p73_p12)
}
  0x88   :  { %s77_s0 = scalar_lea.hbm %s129_s1, 128 }
  0x89   :  { %p78_p13 = scmp.ne.s32.totalorder %s129_s1, %s77_s0  ;;  %p81_p0 = scmp.lt.u32.totalorder %s77_s0, %s129_s1 }
  0x8b   :  { %p83_p1 = pnand %p81_p0, %p78_p13 }
  0x8d   :  { %86 = shalt.err (!%p83_p1)
}
  0x8e   :  { %34 = dma.vmem_to_hbm [thread:$0]  %s32_s20, 128, %s129_s1, [#allocation4]  }
  0x8f   :  { %89 = dma.done.wait [#allocation4], 128  }
  0x90   :  { %90 = vsyncadd [#allocation4], 4294967168 }
  0x91   :  { %38 = vsyncpa [#allocation3], 1 }
  0x92   :  { %39 = vsyncpa [#allocation4], 1 }

// kernel: tpu_custom_call.1
= control target key start
LH: loop header
LB: loop body
LE: loop exit
PB: predicated region body
PF: predicated region fallthrough
CT: control target
= control target key end

     0   :  { %9 = vsyncpa [#allocation3], 0  ;;  %s1032_s0 = inlined_call_operand.hbm [shape: f32[4,16,128], index: 0, kind: input, shape index: {}]   ;;  %s1033_s1 = inlined_call_operand.hbm [shape: f32[1,16,128], index: 1, kind: input, shape index: {}]   ;;  %s1034_s2 = inlined_call_operand.hbm [shape: f32[1,16,128], index: 2, kind: input, shape index: {}]   ;;  %s1035_s3 = inlined_call_operand.vmem [shape: s32[1,128], index: 3, kind: input, shape index: {}]   ;;  %s1036_s4 = inlined_call_operand.hbm [shape: f32[4,16,128], index: 4, kind: output, shape index: {}]  }
   0x1   :  { %11 = vsyncpa [#allocation3 + $0x1], 0 }
   0x2   :  { %12 = vsyncpa [#allocation6], 0 }
   0x3   :  { %13 = vsyncpa [#allocation4], 0 }
   0x4   :  { %15 = vsyncpa [#allocation4 + $0x1], 0  ;;  %s768_s15 = smov 0   ;;  %s770_s16 = smov 0  }
   0x5   :  { %s772_s17 = smov 0   ;;  %s774_s18 = smov 0  }
   0x6   :  { %s776_s19 = smov 0   ;;  %s778_s20 = smov 0  }
   0x7 LB: > { %s447_s21 = sadd.s32 4294967295, %s730_s20   ;;  %s448_s22 = sadd.s32 4294967294, %s730_s20   ;;  %s730_s20 = sphi %s778_s20, %s21_s20   ;;  %s726_s19 = sphi %s776_s19, %s1058_s19   ;;  %s722_s18 = sphi %s774_s18, %s1057_s18   ;;  %s718_s17 = sphi %s772_s17, %s1056_s17   ;;  %s714_s16 = sphi %s770_s16, %s1055_s16   ;;  %s710_s15 = sphi %s768_s15, %s1054_s15  }
   0x8   : > { %p55_p0 = scmp.ne.s32.totalorder %s714_s16, %s710_s15  ;;  %p802_p1 = scmp.eq.s32.totalorder %s447_s21, 0 }
   0x9   : > { %p806_p2 = scmp.eq.s32.totalorder %s447_s21, 3  ;;  %p160_p3 = scmp.eq.s32.totalorder %s448_s22, 3 }
   0xa   : > { %s1041_s23 = scalar_select %p802_p1, 1, 0 }
   0xb   : > { %s1042_s24 = scalar_select %p806_p2, 1, 0 }
   0xc   : > { %p812_p4 = por %p802_p1, %p55_p0  ;;  %p449_p5 = scmp.ge.s32.totalorder %s730_s20, 1 }
   0xd   : > { %p817_p6 = por %p160_p3, %p55_p0  ;;  %p167_p7 = scmp.lt.s32.totalorder %s730_s20, 5 }
   0xe   : > { %s1043_s25 = scalar_select %p812_p4, 1, 0 }
   0xf   : > { %s1044_s26 = scalar_select %p817_p6, 1, 0 }
  0x10   : > { %p822_p8 = pnand %p449_p5, %p167_p7  ;;  %s732_s28 = smov [#allocation5]  }
  0x11   : > { %s182_s29 = sshll.u32 %s732_s28, 4  ;;  %s733_s5 = smov [#allocation7]   ;;  %s183_s29 = int_to_ptr.vmem [resolvable:$true] %s182_s29 }
  0x12   : > { %s1045_s27 = scalar_select %p822_p8, 1, 0 }
  0x13   : > { %p480_p9 = pneg %p822_p8  ;;  %s198_s6 = sshll.u32 %s733_s5, 4  ;;  %s834_s6 = int_to_ptr.vmem [resolvable:$true] %s198_s6 }
  0x14   : > { %s558_s9 = scalar_lea.hbm %s1033_s1, 256 }
  0x15   : > { %p830_p10 = pnand %p480_p9, %p802_p1  ;;  %p559_p11 = scmp.ne.s32.totalorder %s1033_s1, %s558_s9 }
  0x16   : > { %p565_p3 = scmp.lt.u32.totalorder %s558_s9, %s1033_s1 }
  0x17   : > { %p560_p12 = pneg %p830_p10 }
  0x19   : > { %p561_p13 = pnand %p560_p12, %p559_p11 }
  0x1b   : > { %p562_p0 = pneg %p561_p13 }
  0x1d   : > { %p567_p5 = pnand %p565_p3, %p562_p0 }
  0x1f   : > { %570 = shalt.err (!%p567_p5)
}
  0x20   : > { %s571_s14 = scalar_lea.vmem %s183_s29, 256  ;;  %p579_p1 = scmp.lt.s32.totalorder %s183_s29, %s183_s29 }
  0x21   : > { %p572_p7 = scmp.ne.s32.totalorder %s183_s29, %s571_s14  ;;  %p580_p4 = scmp.lt.s32.totalorder %s571_s14, %s571_s14 }
  0x23   : > { %p574_p9 = pnand %p572_p7, %p560_p12  ;;  %p581_p8 = por %p580_p4, %p579_p1 }
  0x25   : > { %p575_p6 = pneg %p574_p9 }
  0x27   : > { %p582_p2 = pnand %p581_p8, %p575_p6 }
  0x29   : > { %585 = shalt.err (!%p582_p2)
}
  0x2a   : > { %s734_s21 = smov 128   ;;  %s735_s22 = smov 8  }
  0x2b   : > { %483 = dma.hbm_to_vmem [thread:$0]  (!%p830_p10), %s1033_s1, 256, %s183_s29, [#allocation6], %s734_s21, %s734_s21, %s735_s22  }
  0x2c   : > { %s586_s9 = scalar_lea.hbm %s1034_s2, 256 }
  0x2d   : > { %p587_p1 = scmp.ne.s32.totalorder %s1034_s2, %s586_s9  ;;  %p593_p6 = scmp.lt.u32.totalorder %s586_s9, %s1034_s2 }
  0x2f   : > { %p589_p2 = pnand %p587_p1, %p560_p12 }
  0x31   : > { %p590_p4 = pneg %p589_p2 }
  0x33   : > { %p595_p8 = pnand %p593_p6, %p590_p4 }
  0x35   : > { %598 = shalt.err (!%p595_p8)
}
  0x36   : > { %s599_s29 = scalar_lea.vmem %s834_s6, 256  ;;  %p607_p3 = scmp.lt.s32.totalorder %s834_s6, %s834_s6 }
  0x37   : > { %p600_p11 = scmp.ne.s32.totalorder %s834_s6, %s599_s29  ;;  %p608_p5 = scmp.lt.s32.totalorder %s599_s29, %s599_s29 }
  0x39   : > { %p602_p13 = pnand %p600_p11, %p560_p12  ;;  %p609_p7 = por %p608_p5, %p607_p3 }
  0x3b   : > { %p603_p0 = pneg %p602_p13 }
  0x3d   : > { %p610_p9 = pnand %p609_p7, %p603_p0 }
  0x3f   : > { %613 = shalt.err (!%p610_p9)
}
  0x40   : > { %486 = dma.hbm_to_vmem [thread:$0]  (!%p830_p10), %s1034_s2, 256, %s834_s6, [#allocation6], %s734_s21, %s734_s21, %s735_s22  }
  0x41   : > { %s30_s30 = sadd.s32 1, %s726_s19  ;;  %s42_s5 = sadd.s32 1, %s718_s17 }
  0x42   : > { %p31_p12 = scmp.ge.s32.totalorder %s30_s30, 4  ;;  %p49_p1 = scmp.ne.s32.totalorder %s718_s17, %s714_s16 }
  0x43   : > { %p50_p2 = scmp.eq.s32.totalorder %s730_s20, 0  ;;  %p497_p4 = scmp.lt.s32.totalorder %s730_s20, 4 }
  0x44   : > { %s1060_s30 = smov (%p31_p12, %s30_s30), 0  ;;  %p1047_p8 = scmp.ne.s32.totalorder %s1042_s24, 0 }
  0x45   : > { %p51_p6 = por %p50_p2, %p49_p1  ;;  %s37_s8 = ssub.s32 %s726_s19, %s1060_s30 }
  0x46   : > { %p899_p11 = por %p1047_p8, %p49_p1  ;;  %s215_s9 = sand.u32 1, %s718_s17  }
  0x47   : > { %p40_p13 = scmp.eq.s32.totalorder %s37_s8, 0  ;;  %s453_s6 = sshll.u32 %s215_s9, 4 }
  0x48   : > { %s466_s10 = sshll.u32 %s726_s19, 8  ;;  %s219_s24 = scalar_lea.vmem [#allocation2], %s453_s6 }
  0x49   : > { %s908_s11 = scalar_select %p40_p13, %s718_s17, %s42_s5  }
  0x4a   : > { %s913_s29 = scalar_lea.hbm %s1032_s0, %s466_s10  ;;  %s228_s14 = sshll.u32 %s219_s24, 4  ;;  %s921_s14 = int_to_ptr.vmem [resolvable:$true] %s228_s14 }
  0x4b   : > { %p917_p10 = pnand %p497_p4, %p51_p6  ;;  %s923_s5 = scalar_lea.sflag [#allocation3], %s215_s9 }
  0x4c   : > { %s614_s8 = scalar_lea.hbm %s913_s29, 256  ;;  %s619_s12 = scalar_lea.hbm %s1032_s0, 1024 }
  0x4d   : > { %p615_p0 = scmp.ne.s32.totalorder %s913_s29, %s614_s8  ;;  %p616_p3 = pneg %p917_p10 }
  0x4e   : > { %p620_p9 = scmp.lt.u32.totalorder %s913_s29, %s1032_s0  ;;  %p621_p12 = scmp.lt.u32.totalorder %s619_s12, %s614_s8 }
  0x4f   : > { %p617_p5 = pnand %p616_p3, %p615_p0  ;;  %p623_p2 = scmp.lt.u32.totalorder %s614_s8, %s913_s29 }
  0x50   : > { %p622_p1 = por %p621_p12, %p620_p9 }
  0x51   : > { %p618_p7 = pneg %p617_p5 }
  0x52   : > { %p624_p4 = por %p623_p2, %p622_p1 }
  0x54   : > { %p625_p6 = pnand %p624_p4, %p618_p7 }
  0x56   : > { %628 = shalt.err (!%p625_p6)
}
  0x57   : > { %s629_s9 = scalar_lea.vmem %s921_s14, 256  ;;  %s736_s6 = smov [#allocation2]  }
  0x58   : > { %p630_p8 = scmp.ne.s32.totalorder %s921_s14, %s629_s9  ;;  %s634_s10 = sshll.u32 %s736_s6, 4  ;;  %s635_s10 = int_to_ptr.vmem [resolvable:$false] %s634_s10 }
  0x59   : > { %s636_s13 = scalar_lea.vmem %s635_s10, 512  ;;  %p637_p5 = scmp.lt.s32.totalorder %s921_s14, %s635_s10 }
  0x5a   : > { %p632_p13 = pnand %p630_p8, %p616_p3  ;;  %p638_p9 = scmp.lt.s32.totalorder %s636_s13, %s629_s9 }
  0x5c   : > { %p633_p0 = pneg %p632_p13  ;;  %p639_p12 = por %p638_p9, %p637_p5 }
  0x5e   : > { %p640_p1 = pnand %p639_p12, %p633_p0 }
  0x60   : > { %643 = shalt.err (!%p640_p1)
}
  0x61   : > { %490 = dma.hbm_to_vmem [thread:$0]  (!%p917_p10), %s913_s29, 256, %s921_s14, %s923_s5, %s734_s21, %s734_s21, %s735_s22  }
  0x62   : > { %p1050_p3 = scmp.ne.s32.totalorder %s1045_s27, 0 }
  0x63   : > { %s957_s8 = sand.u32 (!%p1050_p3), 1, %s714_s16   ;;  %p1051_p7 = scmp.ne.s32.totalorder (!%p1050_p3), %s1043_s25, 0 }
  0x64   : > { %240 = sbr.rel (%p1050_p3) target bundleno = 251 (0xfb), region = 36  ;;  %s457_s12 = sshll.u32 (!%p1050_p3), %s957_s8, 4 }
  0x65   : > { %s243_s24 = scalar_lea.sflag (!%p1050_p3), [#allocation3], %s957_s8  ;;  %s246_s28 = scalar_lea.vmem (!%p1050_p3), [#allocation2], %s457_s12 }
  0x6b   : > { %697 = dma.done.wait (%p1051_p7), %s243_s24, 256  }
  0x6c   : > { %699 = vsyncadd (%p1051_p7), %s243_s24, 4294967040  ;;  %p1052_p10 = scmp.ne.s32.totalorder %s1041_s23, 0 }
  0x6e   : > { %701 = dma.done.wait (%p1052_p10), [#allocation6], 512  }
  0x6f   : > { %703 = vsyncadd (%p1052_p10), [#allocation6], 4294966784  ;;  %v283_v0 = vld [vmem:[%s246_s28] sm:$0xff]  ;;  %s737_s27 = smov 127   ;;  %s738_s21 = smov 1   ;;  %v284_v1 = vld [vmem:[%s246_s28 + $0x8] sm:$0xff]  ;;  %v306_v2 = vlaneseq }
  0x70   : > { %297 = vrot.lane.b32.xlu1 %v283_v0, %s737_s27  ;;  %291 = vrot.lane.b32.xlu0 %v283_v0, %s738_s21  ;;  %v303_v3 = vld [vmem:[%s1035_s3] sm:$0x1]  ;;  %v739_v6 = vmov 0   ;;  %v287_v10 = vld [vmem:[#allocation7] sm:$0xff]  ;;  %v286_v14 = vld [vmem:[#allocation5 + $0x8] sm:$0xff]  ;;  %s278_s23 = scalar_lea.vmem [#allocation8], %s457_s12 }
  0x71   : > { %v307_v4 = vshrl.u32 %v306_v2, 7  ;;  %vm304_vm0 = vcmp.ne.s32.totalorder %v303_v3, 0  ;;  %v285_v9 = vld [vmem:[#allocation5] sm:$0xff]  ;;  %s337_s25 = sshll.u32 %s278_s23, 4  ;;  %v288_v17 = vld [vmem:[#allocation7 + $0x8] sm:$0xff]  ;;  %v314_v18 = vmul.f32 %v286_v14, %v284_v1  ;;  %s467_s14 = sshll.u32 %s722_s18, 8  ;;  %s979_s25 = int_to_ptr.vmem [resolvable:$true] %s337_s25 }
  0x72   : > { %v305_v7 = vsel %vm304_vm0, 1, %v739_v6  ;;  %v313_v11 = vmul.f32 %v285_v9, %v283_v0  ;;  %s984_s6 = scalar_lea.hbm %s1036_s4, %s467_s14  ;;  %s322_s10 = scalar_lea.sflag [#allocation4], %s957_s8 }
  0x73   : > { %v308_v5 = vsub.s32 0, %v307_v4  ;;  %s644_s13 = scalar_lea.vmem %s979_s25, 256  ;;  %s740_s18 = smov [#allocation8]  }
  0x74   : > { %299 = vrot.lane.b32.xlu1 %v284_v1, %s737_s27  ;;  %293 = vrot.lane.b32.xlu0 %v284_v1, %s738_s21  ;;  %p645_p2 = scmp.ne.s32.totalorder %s979_s25, %s644_s13  ;;  %s648_s12 = sshll.u32 %s740_s18, 4  ;;  %s649_s12 = int_to_ptr.vmem [resolvable:$false] %s648_s12 }
  0x75   : > { %v309_v8 = vrot.slane %v305_v7, %v308_v5  ;;  %s650_s24 = scalar_lea.vmem %s649_s12, 512  ;;  %p651_p8 = scmp.lt.s32.totalorder %s979_s25, %s649_s12 }
  0x76   : > { %p646_p4 = pnand %p645_p2, %p899_p11  ;;  %p652_p13 = scmp.lt.s32.totalorder %s650_s24, %s644_s13 }
  0x77   : > { %vm310_vm1 = vcmp.eq.s32.totalorder %v309_v8, 1 }
  0x78   : > { %p647_p6 = pneg %p646_p4  ;;  %p653_p0 = por %p652_p13, %p651_p8 }
  0x7a   : > { %p654_p5 = pnand %p653_p0, %p647_p6 }
  0xe2   : > { %v298_v12 = vpop.permute.xlu1 %297  ;;  %v292_v13 = vpop.permute.xlu0 %291 }
  0xe3   : > { %v311_v15 = vsel %vm310_vm1, %v298_v12, %v292_v13 }
  0xe4   : > { %v315_v16 = vmul.f32 %v311_v15, %v287_v10 }
  0xe6   : > { %v317_v19 = vadd.f32 %v315_v16, %v313_v11  ;;  %v300_v20 = vpop.permute.xlu1 %299  ;;  %v294_v21 = vpop.permute.xlu0 %293 }
  0xe7   : > { %v312_v22 = vsel %vm310_vm1, %v300_v20, %v294_v21 }
  0xe8   : > { %319 = vst [vmem:[%s278_s23] sm:$0xff] %v317_v19  ;;  %v316_v23 = vmul.f32 %v312_v22, %v288_v17 }
  0xea   : > { %v318_v24 = vadd.f32 %v316_v23, %v314_v18 }
  0xec   : > { %320 = vst [vmem:[%s278_s23 + $0x8] sm:$0xff] %v318_v24 }
  0xed   : > { %657 = shalt.err (!%p654_p5)
}
  0xee   : > { %s658_s28 = scalar_lea.hbm %s984_s6, 256  ;;  %s662_s22 = scalar_lea.hbm %s1036_s4, 1024 }
  0xef   : > { %p659_p9 = scmp.ne.s32.totalorder %s984_s6, %s658_s28  ;;  %p663_p3 = scmp.lt.u32.totalorder %s984_s6, %s1036_s4 }
  0xf0   : > { %p664_p7 = scmp.lt.u32.totalorder %s662_s22, %s658_s28  ;;  %p666_p2 = scmp.lt.u32.totalorder %s658_s28, %s984_s6 }
  0xf1   : > { %p660_p12 = pnand %p659_p9, %p899_p11 }
  0xf2   : > { %p665_p10 = por %p664_p7, %p663_p3 }
  0xf3   : > { %p661_p1 = pneg %p660_p12 }
  0xf4   : > { %p667_p4 = por %p666_p2, %p665_p10 }
  0xf6   : > { %p668_p6 = pnand %p667_p4, %p661_p1 }
  0xf8   : > { %671 = shalt.err (!%p668_p6)
}
  0xf9   : > { %s741_s14 = smov 128   ;;  %s742_s5 = smov 8  }
  0xfa   : > { %478 = dma.vmem_to_hbm [thread:$0]  (%p899_p11), %s979_s25, 256, %s984_s6, %s322_s10, %s741_s14, %s741_s14, %s742_s5  }
  0xfb PF: > { %p500_p8 = scmp.ge.s32.totalorder %s730_s20, 2  ;;  %s352_s9 = sand.u32 1, %s710_s15  }
  0xfc   : > { %p1053_p13 = scmp.ne.s32.totalorder %s1044_s26, 0  ;;  %s353_s13 = scalar_lea.sflag [#allocation4], %s352_s9 }
  0xfe   : > { %p492_p0 = pnand %p500_p8, %p1053_p13 }
 0x100   : > { %705 = dma.done.wait (!%p492_p0), %s353_s13, 256  }
 0x101   : > { %707 = vsyncadd (!%p492_p0), %s353_s13, 4294967040  ;;  %s21_s20 = sadd.s32 1, %s730_s20   ;;  %s1054_s15 = smov %s714_s16 }
 0x102   : > { %p18_p5 = scmp.ge.s32.totalorder %s21_s20, 6   ;;  %s1055_s16 = smov %s718_s17 }
 0x103   : > { %s1056_s17 = smov %s908_s11  ;;  %s1057_s18 = smov %s726_s19 }
 0x104   : > { %s1058_s19 = smov %s1060_s30  ;;  %20 = sbr.rel (!%p18_p5) target bundleno = 7 (0x7), region = 91 }
 0x10b   :  { %358 = vsyncpa [#allocation3], 1 }
 0x10c   :  { %360 = vsyncpa [#allocation3 + $0x1], 1 }
 0x10d   :  { %361 = vsyncpa [#allocation6], 1 }
 0x10e   :  { %362 = vsyncpa [#allocation4], 1 }
 0x10f   :  { %364 = vsyncpa [#allocation4 + $0x1], 1 }

</bundles_post_ra>
